<compile_context>
chip_gen: v6e
topology: v6e:2x2x1
jax: 0.10.0
libtpu: 0.0.40
codegen_flags: <defaults>
</compile_context>

<pallas_src>
import jax
import jax.numpy as jnp
from jax import lax
from jax.experimental import pallas as pl
from jax.experimental.pallas import tpu as pltpu


def _round_up(x, m):
    return ((x + m - 1) // m) * m


def _pick_tile(n, pref):
    """Largest multiple of 128 that is <= pref and divides n (n is a multiple of 128)."""
    t = min(pref, n)
    t -= t % 128
    while n % t:
        t -= 128
    return t


# ---------------- Phase 1: h = relu(adj @ support) ----------------
def _gcn_relu_kernel(adj_ref, s_ref, h_ref, acc_ref):
    k = pl.program_id(1)

    @pl.when(k == 0)
    def _():
        acc_ref[...] = jnp.zeros_like(acc_ref)

    # In-kernel bf16 cast of the adj tile (no-op if the wrapper already handed us
    # bf16 from a fused pad+cast); bf16 MXU operands, f32 accumulation.
    acc_ref[...] += jnp.dot(adj_ref[...].astype(jnp.bfloat16), s_ref[...],
                            preferred_element_type=jnp.float32)

    @pl.when(k == pl.num_programs(1) - 1)
    def _():
        # ReLU epilogue in f32 on the VPU; store h in bf16 (halves phase-2 HBM bytes).
        # TODO(synk): F.dropout(training=True) would need pltpu.prng_seed/prng_random_bits;
        #             eval mode => identity.
        h_ref[...] = jnp.maximum(acc_ref[...], 0.0).astype(h_ref.dtype)


# ---------------- Phase 2: out = h @ h.T (tiled gram matmul) ----------------
def _gram_kernel(hi_ref, hj_ref, o_ref):
    # Contract the last (H) axis of both operands: MXU consumes h directly, no transpose.
    o_ref[...] = lax.dot_general(
        hi_ref[...], hj_ref[...],
        dimension_numbers=(((1,), (1,)), ((), ())),
        preferred_element_type=jnp.float32)


def structure_decoder(x, adj, w, b):
    """Structure_Decoder forward (eval mode).

    x: [N, H], adj: [N, N], w: [H, H], b: [1, H] -> [N, N] float32.
    Tiles are picked as the largest 128-multiples (<= 512 rows / <= 2048 reduction
    for phase 1, <= 512x512 for phase 2) that divide the padded node count, so
    padding never exceeds 127 rows/cols and the VMEM footprint (~10.5 MiB worst
    case) stays inside the default scoped VMEM limit on v5e/v6e/v7x.
    """
    N, H = x.shape
    assert adj.shape == (N, N) and w.shape == (H, H) and b.shape == (1, H)

    # Minimal padding: node axis up to a multiple of 128 only.
    Np = _round_up(N, 128)

    # Tile sizes (divisors of Np).
    tm1 = _pick_tile(Np, 512)    # phase-1 output row panel
    tk1 = _pick_tile(Np, 2048)   # phase-1 reduction (adj column) panel
    tm2 = _pick_tile(Np, 512)    # phase-2 output tiles
    tn2 = _pick_tile(Np, 512)

    # Phase 0: support = x @ W + b, computed once (tiny: N x H with small H),
    # then cast to bf16 for the MXU. Padded rows (if any) are zero -> padded adj
    # rows produce h = relu(0) = 0 and padded columns multiply zero adj entries,
    # so the top-left [N, N] block of the result is exact.
    support = (jnp.dot(x, w) + b).astype(jnp.bfloat16)
    if Np != N:
        support = jnp.pad(support, ((0, Np - N), (0, 0)))
        # Fuse pad + bf16 cast into a single XLA pass over the big array
        # (read 4B/elem, write 2B/elem; kernel then streams 2B/elem).
        adj_in = jnp.pad(adj, ((0, Np - N), (0, Np - N))).astype(jnp.bfloat16)
    else:
        # No padding needed: stream f32 adj straight from HBM and cast per-tile
        # inside the kernel (4B/elem total adj traffic, no standalone astype pass).
        adj_in = adj

    # Phase 1: h = relu(adj @ support); reduction axis (k) last, output resident
    # across k (accumulator pattern).
    h = pl.pallas_call(
        _gcn_relu_kernel,
        out_shape=jax.ShapeDtypeStruct((Np, H), jnp.bfloat16),
        grid_spec=pltpu.PrefetchScalarGridSpec(
            num_scalar_prefetch=0,
            grid=(Np // tm1, Np // tk1),
            in_specs=[
                pl.BlockSpec((tm1, tk1), lambda i, k: (i, k)),  # adj panel (streamed)
                pl.BlockSpec((tk1, H), lambda i, k: (k, 0)),    # support K-panel
            ],
            out_specs=pl.BlockSpec((tm1, H), lambda i, k: (i, 0)),
            scratch_shapes=[pltpu.VMEM((tm1, H), jnp.float32)],
        ),
        compiler_params=pltpu.CompilerParams(
            dimension_semantics=("parallel", "arbitrary")),
    )(adj_in, support)

    # Phase 2: out = h @ h.T over (i, j) output tiles (lane-dense tn2-wide f32 stores).
    # H is small and loaded whole, so no reduction grid axis is needed.
    out = pl.pallas_call(
        _gram_kernel,
        out_shape=jax.ShapeDtypeStruct((Np, Np), jnp.float32),
        grid_spec=pltpu.PrefetchScalarGridSpec(
            num_scalar_prefetch=0,
            grid=(Np // tm2, Np // tn2),
            in_specs=[
                pl.BlockSpec((tm2, H), lambda i, j: (i, 0)),    # h row-panel i
                pl.BlockSpec((tn2, H), lambda i, j: (j, 0)),    # h row-panel j
            ],
            out_specs=pl.BlockSpec((tm2, tn2), lambda i, j: (i, j)),
        ),
        compiler_params=pltpu.CompilerParams(
            dimension_semantics=("parallel", "parallel")),
    )(h, h)

    if Np != N:
        out = out[:N, :N]
    return out


def structure_decoder_ref(x, adj, w, b):
    """Pure-JAX reference mirroring the kernel's dtype path (bf16 MXU operands, f32 acc)."""
    support = (jnp.dot(x, w) + b).astype(jnp.bfloat16)
    h = jnp.maximum(
        jnp.dot(adj.astype(jnp.bfloat16), support,
                preferred_element_type=jnp.float32), 0.0).astype(jnp.bfloat16)
    return lax.dot_general(h, h, dimension_numbers=(((1,), (1,)), ((), ())),
                           preferred_element_type=jnp.float32)


if __name__ == "__main__":
    key = jax.random.PRNGKey(0)
    k_x, k_adj, k_w, k_b = jax.random.split(key, 4)

    N = 256     # number of graph nodes (small test shape)
    nhid = 32   # hidden feature dim

    x = jax.random.normal(k_x, (N, nhid), dtype=jnp.float32)

    # symmetric, self-looped, row-normalized adjacency (typical GCN input)
    a = jax.random.uniform(k_adj, (N, N), dtype=jnp.float32)
    a = (a + a.T) * 0.5 + jnp.eye(N, dtype=jnp.float32)
    adj = a / jnp.sum(a, axis=1, keepdims=True)

    # deterministic parameter init (Glorot-ish scale)
    scale = 1.0 / jnp.sqrt(jnp.float32(nhid))
    w = jax.random.uniform(k_w, (nhid, nhid), dtype=jnp.float32,
                           minval=-scale, maxval=scale)
    b = jax.random.uniform(k_b, (1, nhid), dtype=jnp.float32,
                           minval=-scale, maxval=scale)

    out = structure_decoder(x, adj, w, b)
    out = jax.block_until_ready(out)

    ref = structure_decoder_ref(x, adj, w, b)
    assert out.shape == (N, N)
    assert jnp.allclose(out, ref, atol=1e-2, rtol=1e-2), "mismatch vs reference"

    print("KERNEL_OK")
</pallas_src>

<mosaic_0001>
module attributes {stable_mosaic.version = 11 : i64} {
  func.func @_gcn_relu_kernel(%arg0: i32, %arg1: i32, %arg2: memref<256x256xf32, #tpu.memory_space<vmem>>, %arg3: memref<256x32xbf16, #tpu.memory_space<vmem>>, %arg4: memref<256x32xbf16, #tpu.memory_space<vmem>>, %arg5: memref<256x32xf32, #tpu.memory_space<vmem>>) attributes {dimension_semantics = [#tpu.dimension_semantics<parallel>, #tpu.dimension_semantics<arbitrary>], iteration_bounds = array<i64: 1, 1>, scalar_prefetch = 0 : i64, scratch_operands = 1 : i64, tpu.core_type = #tpu.core_type<tc>, window_params = [{transform_indices = @transform_0, window_bounds = array<i64: 256, 256>}, {transform_indices = @transform_1, window_bounds = array<i64: 256, 32>}, {transform_indices = @transform_2, window_bounds = array<i64: 256, 32>}]} {
    %c0_i32 = arith.constant 0 : i32
    %0 = arith.cmpi eq, %arg1, %c0_i32 : i32
    %1 = arith.extui %0 : i1 to i32
    %c0_i32_0 = arith.constant 0 : i32
    %2 = arith.cmpi ne, %1, %c0_i32_0 : i32
    scf.if %2 {
      %cst_10 = arith.constant 0.000000e+00 : f32
      %13 = vector.broadcast %cst_10 : f32 to vector<256x32xf32>
      %c0_11 = arith.constant 0 : index
      %c0_12 = arith.constant 0 : index
      %14 = vector.load %arg5[%c0_11, %c0_12] : memref<256x32xf32, #tpu.memory_space<vmem>>, vector<256x32xf32>
      tpu.vector_store %arg5[%c0_11, %c0_12], %13 {strides = array<i32>} : memref<256x32xf32, #tpu.memory_space<vmem>>, vector<256x32xf32>,
    } else {
    }
    %c0 = arith.constant 0 : index
    %c0_1 = arith.constant 0 : index
    %3 = vector.load %arg5[%c0, %c0_1] : memref<256x32xf32, #tpu.memory_space<vmem>>, vector<256x32xf32>
    %c0_2 = arith.constant 0 : index
    %c0_3 = arith.constant 0 : index
    %4 = vector.load %arg2[%c0_2, %c0_3] : memref<256x256xf32, #tpu.memory_space<vmem>>, vector<256x256xf32>
    %5 = arith.truncf %4 : vector<256x256xf32> to vector<256x256xbf16>
    %c0_4 = arith.constant 0 : index
    %c0_5 = arith.constant 0 : index
    %6 = vector.load %arg3[%c0_4, %c0_5] : memref<256x32xbf16, #tpu.memory_space<vmem>>, vector<256x32xbf16>
    %cst = arith.constant dense<0.000000e+00> : vector<256x32xf32>
    %7 = tpu.matmul %5, %6, %cst {dimension_numbers = #tpu.dot_dimension_numbers<[1], [0], [0], [1], [0, 0, 1, 1], [], []>} : vector<256x256xbf16>, vector<256x32xbf16>, vector<256x32xf32> -> vector<256x32xf32>
    %8 = arith.addf %3, %7 : vector<256x32xf32>
    %c0_6 = arith.constant 0 : index
    %c0_7 = arith.constant 0 : index
    %9 = vector.load %arg5[%c0_6, %c0_7] : memref<256x32xf32, #tpu.memory_space<vmem>>, vector<256x32xf32>
    tpu.vector_store %arg5[%c0_6, %c0_7], %8 {strides = array<i32>} : memref<256x32xf32, #tpu.memory_space<vmem>>, vector<256x32xf32>,
    %c0_i32_8 = arith.constant 0 : i32
    %10 = arith.cmpi eq, %arg1, %c0_i32_8 : i32
    %11 = arith.extui %10 : i1 to i32
    %c0_i32_9 = arith.constant 0 : i32
    %12 = arith.cmpi ne, %11, %c0_i32_9 : i32
    scf.if %12 {
      %c0_10 = arith.constant 0 : index
      %c0_11 = arith.constant 0 : index
      %13 = vector.load %arg5[%c0_10, %c0_11] : memref<256x32xf32, #tpu.memory_space<vmem>>, vector<256x32xf32>
      %cst_12 = arith.constant 0.000000e+00 : f32
      %14 = vector.broadcast %cst_12 : f32 to vector<256x32xf32>
      %15 = arith.maximumf %13, %14 : vector<256x32xf32>
      %16 = arith.truncf %15 : vector<256x32xf32> to vector<256x32xbf16>
      %c0_13 = arith.constant 0 : index
      %c0_14 = arith.constant 0 : index
      %17 = vector.load %arg4[%c0_13, %c0_14] : memref<256x32xbf16, #tpu.memory_space<vmem>>, vector<256x32xbf16>
      tpu.vector_store %arg4[%c0_13, %c0_14], %16 {strides = array<i32>} : memref<256x32xbf16, #tpu.memory_space<vmem>>, vector<256x32xbf16>,
    } else {
    }
    return
  }
  func.func @transform_0(%arg0: i32, %arg1: i32) -> (i32, i32) {
    %c0_i32 = arith.constant 0 : i32
    return %arg0, %arg1 : i32, i32
  }
  func.func @transform_1(%arg0: i32, %arg1: i32) -> (i32, i32) {
    %c0_i32 = arith.constant 0 : i32
    %c0_i32_0 = arith.constant 0 : i32
    return %arg1, %c0_i32 : i32, i32
  }
  func.func @transform_2(%arg0: i32, %arg1: i32) -> (i32, i32) {
    %c0_i32 = arith.constant 0 : i32
    %c0_i32_0 = arith.constant 0 : i32
    return %arg0, %c0_i32 : i32, i32
  }
}

</mosaic_0001>

<bundles_post_ra>
// kernel: tpu_custom_call.1
= control target key start
LH: loop header
LB: loop body
LE: loop exit
PB: predicated region body
PF: predicated region fallthrough
CT: control target
= control target key end

     0   :  { %7 = vsyncpa [#allocation4], 0  ;;  %s1028_s9 = smov [#allocation3]   ;;  %s1290_s0 = inlined_call_operand.hbm [shape: f32[256,256], index: 0, kind: input, shape index: {}]   ;;  %s1291_s1 = inlined_call_operand.vmem [shape: bf16[256,32], index: 1, kind: input, shape index: {}]   ;;  %s1292_s2 = inlined_call_operand.vmem [shape: bf16[256,32], index: 2, kind: output, shape index: {}]  }
   0x1   :  { %s13_s10 = sshll.u32 %s1028_s9, 4  ;;  %s14_s10 = int_to_ptr.vmem [resolvable:$true] %s13_s10 }
   0x2   :  { %s1014_s11 = scalar_lea.vmem %s14_s10, 8192  ;;  %p1019_p1 = scmp.lt.s32.totalorder %s14_s10, %s14_s10 }
   0x3   :  { %p1015_p0 = scmp.ne.s32.totalorder %s14_s10, %s1014_s11  ;;  %p1020_p2 = scmp.lt.s32.totalorder %s1014_s11, %s1014_s11 }
   0x5   :  { %p1021_p3 = por %p1020_p2, %p1019_p1 }
   0x7   :  { %p1022_p4 = pnand %p1021_p3, %p1015_p0 }
   0x9   :  { %1025 = shalt.err (!%p1022_p4)
}
   0xa   :  { %s1029_s12 = smov 256   ;;  %s1030_s13 = smov 16  }
   0xb   :  { %19 = dma.hbm_to_vmem [thread:$0]  %s1290_s0, 8192, %s14_s10, [#allocation4], %s1029_s12, %s1029_s12, %s1030_s13  }
   0xc   :  { %1026 = dma.done.wait [#allocation4], 8192  }
   0xd   :  { %1027 = vsyncadd [#allocation4], 4294959104  ;;  %v990_v0 = vld [vmem:[%s1291_s1 + $0x78] sm:$0xff]   ;;  %v992_v2 = vld [vmem:[%s1291_s1 + $0x70] sm:$0xff]   ;;  %vm30_vm0 = vcmask 261120   ;;  %vm740_vm1 = vcmask 257024  }
   0xe   :  { %v991_v1 = vld [vmem:[%s1291_s1 + $0x38] sm:$0xff]   ;;  %858 = vmatprep.subr.bf16.mxu0 %v990_v0  ;;  %970 = vmatprep.subr.bf16.mxu1 %v990_v0  ;;  %v993_v3 = vld [vmem:[%s1291_s1 + $0x30] sm:$0xff]   ;;  %v994_v4 = vld [vmem:[%s1291_s1 + $0x68] sm:$0xff]  }
   0xf   :  { %859 = vmatpush3.bf16.msra.mxu0 %v991_v1  ;;  %978 = vmatpush3.bf16.msra.mxu1 %v991_v1  ;;  %v995_v5 = vld [vmem:[%s1291_s1 + $0x28] sm:$0xff]   ;;  %v996_v6 = vld [vmem:[%s1291_s1 + $0x60] sm:$0xff]   ;;  %v998_v8 = vld [vmem:[%s1291_s1 + $0x58] sm:$0xff]  }
  0x10   :  { %860 = vmatprep.subr.bf16.mxu0 %v992_v2  ;;  %971 = vmatprep.subr.bf16.mxu1 %v992_v2  ;;  %v997_v7 = vld [vmem:[%s1291_s1 + $0x20] sm:$0xff]   ;;  %v999_v9 = vld [vmem:[%s1291_s1 + $0x18] sm:$0xff]   ;;  %v1000_v10 = vld [vmem:[%s1291_s1 + $0x50] sm:$0xff]  }
  0x11   :  { %v96_v11 = vld [vmem:[#allocation3 + $0x8] sm:$0xff]  ;;  %v98_v12 = vld [vmem:[#allocation3 + $0x18] sm:$0xff]  ;;  %v1001_v17 = vld [vmem:[%s1291_s1 + $0x10] sm:$0xff]  }
  0x12   :  { %v128_v13 = vld [vmem:[#allocation3 + $0x108] sm:$0xff]  ;;  %v160_v14 = vpack.c.bf16 %v98_v12, %v96_v11  ;;  %v130_v15 = vld [vmem:[#allocation3 + $0x118] sm:$0xff]  ;;  %v1004_v20 = vld [vmem:[%s1291_s1 + $0x40] sm:$0xff]  }
  0x13   :  { %861 = vmatpush3.bf16.msra.mxu0 %v993_v3  ;;  %979 = vmatpush3.bf16.msra.mxu1 %v993_v3  ;;  %v176_v16 = vpack.c.bf16 %v130_v15, %v128_v13  ;;  %v1002_v18 = vld [vmem:[%s1291_s1 + $0x48] sm:$0xff]   ;;  %v1005_v21 = vld [vmem:[%s1291_s1] sm:$0xff]   ;;  %v97_v23 = vld [vmem:[#allocation3 + $0x10] sm:$0xff] }
  0x14   :  { %862 = vmatprep.subr.bf16.mxu0 %v994_v4  ;;  %972 = vmatprep.subr.bf16.mxu1 %v994_v4  ;;  %v1003_v19 = vld [vmem:[%s1291_s1 + $0x8] sm:$0xff]   ;;  %v95_v22 = vld [vmem:[#allocation3] sm:$0xff]  ;;  %v129_v25 = vld [vmem:[#allocation3 + $0x110] sm:$0xff] }
  0x15   :  { %351 = vmatprep.mubr.bf16.mxu0 %v160_v14  ;;  %415 = vmatprep.mubr.bf16.mxu1 %v176_v16  ;;  %v127_v24 = vld [vmem:[#allocation3 + $0x100] sm:$0xff]  ;;  %v100_v26 = vld [vmem:[#allocation3 + $0x28] sm:$0xff]  ;;  %v102_v27 = vld [vmem:[#allocation3 + $0x38] sm:$0xff]  ;;  %v159_v30 = vpack.c.bf16 %v97_v23, %v95_v22 }
  0x16   :  { %v132_v28 = vld [vmem:[#allocation3 + $0x128] sm:$0xff]  ;;  %v134_v29 = vld [vmem:[#allocation3 + $0x138] sm:$0xff]  ;;  %v175_v31 = vpack.c.bf16 %v129_v25, %v127_v24  ;;  %v162_v32 = vpack.c.bf16 %v102_v27, %v100_v26  ;;  %v99_v34 = vld [vmem:[#allocation3 + $0x20] sm:$0xff] }
  0x17   :  { %863 = vmatpush3.bf16.msra.mxu0 %v995_v5  ;;  %980 = vmatpush3.bf16.msra.mxu1 %v995_v5  ;;  %v178_v33 = vpack.c.bf16 %v134_v29, %v132_v28  ;;  %v101_v35 = vld [vmem:[#allocation3 + $0x30] sm:$0xff]  ;;  %v131_v36 = vld [vmem:[#allocation3 + $0x120] sm:$0xff]  ;;  %v104_v38 = vld [vmem:[#allocation3 + $0x48] sm:$0xff] }
  0x18   :  { %864 = vmatprep.subr.bf16.mxu0 %v996_v6  ;;  %973 = vmatprep.subr.bf16.mxu1 %v996_v6  ;;  %v133_v37 = vld [vmem:[#allocation3 + $0x130] sm:$0xff]  ;;  %v106_v39 = vld [vmem:[#allocation3 + $0x58] sm:$0xff]  ;;  %v136_v40 = vld [vmem:[#allocation3 + $0x148] sm:$0xff]  ;;  %v161_v42 = vpack.c.bf16 %v101_v35, %v99_v34 }
  0x19   :  { %v138_v41 = vld [vmem:[#allocation3 + $0x158] sm:$0xff]  ;;  %v177_v43 = vpack.c.bf16 %v133_v37, %v131_v36  ;;  %v164_v44 = vpack.c.bf16 %v106_v39, %v104_v38  ;;  %v103_v46 = vld [vmem:[#allocation3 + $0x40] sm:$0xff]  ;;  %v105_v47 = vld [vmem:[#allocation3 + $0x50] sm:$0xff] }
  0x1a   :  { %v180_v45 = vpack.c.bf16 %v138_v41, %v136_v40  ;;  %v135_v48 = vld [vmem:[#allocation3 + $0x140] sm:$0xff]  ;;  %v137_v49 = vld [vmem:[#allocation3 + $0x150] sm:$0xff]  ;;  %v108_v50 = vld [vmem:[#allocation3 + $0x68] sm:$0xff]  ;;  %v163_v54 = vpack.c.bf16 %v105_v47, %v103_v46 }
  0x1b   :  { %865 = vmatpush3.bf16.msra.mxu0 %v997_v7  ;;  %981 = vmatpush3.bf16.msra.mxu1 %v997_v7  ;;  %v110_v51 = vld [vmem:[#allocation3 + $0x78] sm:$0xff]  ;;  %v140_v52 = vld [vmem:[#allocation3 + $0x168] sm:$0xff]  ;;  %v179_v55 = vpack.c.bf16 %v137_v49, %v135_v48  ;;  %v107_v58 = vld [vmem:[#allocation3 + $0x60] sm:$0xff]  ;;  %v1031_v48 = vmov 0.0  }
  0x1c   :  { %866 = vmatprep.subr.bf16.mxu0 %v998_v8  ;;  %974 = vmatprep.subr.bf16.mxu1 %v998_v8  ;;  %v142_v53 = vld [vmem:[#allocation3 + $0x178] sm:$0xff]  ;;  %v166_v56 = vpack.c.bf16 %v110_v51, %v108_v50  ;;  %v109_v59 = vld [vmem:[#allocation3 + $0x70] sm:$0xff]  ;;  %v139_v60 = vld [vmem:[#allocation3 + $0x160] sm:$0xff]  ;;  %31 = vst.msk [vmem:[#allocation2] sm:$0xff] %vm30_vm0, %v1031_v48 }
  0x1d   :  { %v182_v57 = vpack.c.bf16 %v142_v53, %v140_v52  ;;  %v141_v61 = vld [vmem:[#allocation3 + $0x170] sm:$0xff]  ;;  %v112_v62 = vld [vmem:[#allocation3 + $0x88] sm:$0xff]  ;;  %v114_v63 = vld [vmem:[#allocation3 + $0x98] sm:$0xff]  ;;  %v165_v2 = vpack.c.bf16 %v109_v59, %v107_v58  ;;  %32 = vst.msk [vmem:[#allocation2 + $0x8] sm:$0xff] %vm30_vm0, %v1031_v48 }
  0x1e   :  { %v144_v0 = vld [vmem:[#allocation3 + $0x188] sm:$0xff]  ;;  %v146_v1 = vld [vmem:[#allocation3 + $0x198] sm:$0xff]  ;;  %v181_v3 = vpack.c.bf16 %v141_v61, %v139_v60  ;;  %v168_v4 = vpack.c.bf16 %v114_v63, %v112_v62  ;;  %v111_v6 = vld [vmem:[#allocation3 + $0x80] sm:$0xff]  ;;  %33 = vst.msk [vmem:[#allocation2 + $0x10] sm:$0xff] %vm30_vm0, %v1031_v48 }
  0x1f   :  { %867 = vmatpush3.bf16.msra.mxu0 %v999_v9  ;;  %982 = vmatpush3.bf16.msra.mxu1 %v999_v9  ;;  %v184_v5 = vpack.c.bf16 %v146_v1, %v144_v0  ;;  %v113_v7 = vld [vmem:[#allocation3 + $0x90] sm:$0xff]  ;;  %v143_v8 = vld [vmem:[#allocation3 + $0x180] sm:$0xff]  ;;  %v118_v11 = vld [vmem:[#allocation3 + $0xb8] sm:$0xff]  ;;  %34 = vst.msk [vmem:[#allocation2 + $0x18] sm:$0xff] %vm30_vm0, %v1031_v48 }
  0x20   :  { %868 = vmatprep.subr.bf16.mxu0 %v1000_v10  ;;  %975 = vmatprep.subr.bf16.mxu1 %v1000_v10  ;;  %v145_v9 = vld [vmem:[#allocation3 + $0x190] sm:$0xff]  ;;  %v116_v10 = vld [vmem:[#allocation3 + $0xa8] sm:$0xff]  ;;  %v150_v13 = vld [vmem:[#allocation3 + $0x1b8] sm:$0xff]  ;;  %v167_v14 = vpack.c.bf16 %v113_v7, %v111_v6  ;;  %35 = vst.msk [vmem:[#allocation2 + $0x20] sm:$0xff] %vm30_vm0, %v1031_v48 }
  0x21   :  { %v148_v12 = vld [vmem:[#allocation3 + $0x1a8] sm:$0xff]  ;;  %v183_v15 = vpack.c.bf16 %v145_v9, %v143_v8  ;;  %v170_v16 = vpack.c.bf16 %v118_v11, %v116_v10  ;;  %v122_v23 = vld [vmem:[#allocation3 + $0xd8] sm:$0xff]  ;;  %36 = vst.msk [vmem:[#allocation2 + $0x28] sm:$0xff] %vm30_vm0, %v1031_v48  ;;  %37 = vst.msk [vmem:[#allocation2 + $0x30] sm:$0xff] %vm30_vm0, %v1031_v48 }
  0x22   :  { %v120_v22 = vld [vmem:[#allocation3 + $0xc8] sm:$0xff]  ;;  %v154_v25 = vld [vmem:[#allocation3 + $0x1d8] sm:$0xff]  ;;  %38 = vst.msk [vmem:[#allocation2 + $0x38] sm:$0xff] %vm30_vm0, %v1031_v48  ;;  %39 = vst.msk [vmem:[#allocation2 + $0x40] sm:$0xff] %vm30_vm0, %v1031_v48 }
  0x23   :  { %869 = vmatpush3.bf16.msra.mxu0 %v1001_v17  ;;  %983 = vmatpush3.bf16.msra.mxu1 %v1001_v17  ;;  %v186_v17 = vpack.c.bf16 %v150_v13, %v148_v12  ;;  %v152_v24 = vld [vmem:[#allocation3 + $0x1c8] sm:$0xff]  ;;  %v172_v28 = vpack.c.bf16 %v122_v23, %v120_v22  ;;  %v126_v35 = vld [vmem:[#allocation3 + $0xf8] sm:$0xff]  ;;  %40 = vst.msk [vmem:[#allocation2 + $0x48] sm:$0xff] %vm30_vm0, %v1031_v48  ;;  %41 = vst.msk [vmem:[#allocation2 + $0x50] sm:$0xff] %vm30_vm0, %v1031_v48 }
  0x24   :  { %870 = vmatprep.subr.bf16.mxu0 %v1002_v18  ;;  %976 = vmatprep.subr.bf16.mxu1 %v1002_v18  ;;  %v115_v18 = vld [vmem:[#allocation3 + $0xa0] sm:$0xff]  ;;  %v188_v29 = vpack.c.bf16 %v154_v25, %v152_v24  ;;  %v124_v34 = vld [vmem:[#allocation3 + $0xe8] sm:$0xff]  ;;  %v158_v37 = vld [vmem:[#allocation3 + $0x1f8] sm:$0xff]  ;;  %42 = vst.msk [vmem:[#allocation2 + $0x58] sm:$0xff] %vm30_vm0, %v1031_v48 }
  0x25   :  { %v156_v36 = vld [vmem:[#allocation3 + $0x1e8] sm:$0xff]  ;;  %v174_v40 = vpack.c.bf16 %v126_v35, %v124_v34  ;;  %43 = vst.msk [vmem:[#allocation2 + $0x60] sm:$0xff] %vm30_vm0, %v1031_v48  ;;  %44 = vst.msk [vmem:[#allocation2 + $0x68] sm:$0xff] %vm30_vm0, %v1031_v48  ;;  %v63_v51 = vld [vmem:[#allocation2] sm:$0xff] }
  0x26   :  { %v190_v41 = vpack.c.bf16 %v158_v37, %v156_v36  ;;  %45 = vst.msk [vmem:[#allocation2 + $0x70] sm:$0xff] %vm30_vm0, %v1031_v48  ;;  %46 = vst.msk [vmem:[#allocation2 + $0x78] sm:$0xff] %vm30_vm0, %v1031_v48  ;;  %v64_v61 = vld [vmem:[#allocation2 + $0x8] sm:$0xff]  ;;  %v65_v7 = vld [vmem:[#allocation2 + $0x10] sm:$0xff] }
  0x27   :  { %871 = vmatpush3.bf16.msra.mxu0 %v1003_v19  ;;  %984 = vmatpush3.bf16.msra.mxu1 %v1003_v19  ;;  %v117_v19 = vld [vmem:[#allocation3 + $0xb0] sm:$0xff]  ;;  %47 = vst.msk [vmem:[#allocation2 + $0x80] sm:$0xff] %vm30_vm0, %v1031_v48  ;;  %48 = vst.msk [vmem:[#allocation2 + $0x88] sm:$0xff] %vm30_vm0, %v1031_v48 }
  0x28   :  { %872 = vmatprep.subr.bf16.mxu0 %v1004_v20  ;;  %977 = vmatprep.subr.bf16.mxu1 %v1004_v20  ;;  %v147_v20 = vld [vmem:[#allocation3 + $0x1a0] sm:$0xff]  ;;  %v169_v26 = vpack.c.bf16 %v117_v19, %v115_v18  ;;  %49 = vst.msk [vmem:[#allocation2 + $0x90] sm:$0xff] %vm30_vm0, %v1031_v48  ;;  %50 = vst.msk [vmem:[#allocation2 + $0x98] sm:$0xff] %vm30_vm0, %v1031_v48 }
  0x29   :  { %51 = vst.msk [vmem:[#allocation2 + $0xa0] sm:$0xff] %vm30_vm0, %v1031_v48  ;;  %52 = vst.msk [vmem:[#allocation2 + $0xa8] sm:$0xff] %vm30_vm0, %v1031_v48 }
  0x2a   :  { %53 = vst.msk [vmem:[#allocation2 + $0xb0] sm:$0xff] %vm30_vm0, %v1031_v48  ;;  %54 = vst.msk [vmem:[#allocation2 + $0xb8] sm:$0xff] %vm30_vm0, %v1031_v48 }
  0x2b   :  { %873 = vmatpush3.bf16.msra.mxu0 %v1005_v21  ;;  %985 = vmatpush3.bf16.msra.mxu1 %v1005_v21  ;;  %v149_v21 = vld [vmem:[#allocation3 + $0x1b0] sm:$0xff]  ;;  %55 = vst.msk [vmem:[#allocation2 + $0xc0] sm:$0xff] %vm30_vm0, %v1031_v48  ;;  %56 = vst.msk [vmem:[#allocation2 + $0xc8] sm:$0xff] %vm30_vm0, %v1031_v48 }
  0x2c   :  { %v185_v27 = vpack.c.bf16 %v149_v21, %v147_v20  ;;  %57 = vst.msk [vmem:[#allocation2 + $0xd0] sm:$0xff] %vm30_vm0, %v1031_v48  ;;  %58 = vst.msk [vmem:[#allocation2 + $0xd8] sm:$0xff] %vm30_vm0, %v1031_v48 }
  0x2d   :  { %59 = vst.msk [vmem:[#allocation2 + $0xe0] sm:$0xff] %vm30_vm0, %v1031_v48  ;;  %60 = vst.msk [vmem:[#allocation2 + $0xe8] sm:$0xff] %vm30_vm0, %v1031_v48 }
  0x2e   :  { %352 = vmatmul.mubr.bf16.vlgmr.msra.gmra.mxu0 %v159_v30  ;;  %416 = vmatmul.mubr.bf16.vlgmr.msra.gmra.mxu1 %v175_v31  ;;  %v119_v30 = vld [vmem:[#allocation3 + $0xc0] sm:$0xff]  ;;  %v121_v31 = vld [vmem:[#allocation3 + $0xd0] sm:$0xff]  ;;  %61 = vst.msk [vmem:[#allocation2 + $0xf0] sm:$0xff] %vm30_vm0, %v1031_v48  ;;  %62 = vst.msk [vmem:[#allocation2 + $0xf8] sm:$0xff] %vm30_vm0, %v1031_v48 }
  0x2f   :  { %359 = vmatprep.mubr.bf16.mxu0 %v162_v32  ;;  %423 = vmatprep.mubr.bf16.mxu1 %v178_v33  ;;  %v151_v32 = vld [vmem:[#allocation3 + $0x1c0] sm:$0xff]  ;;  %v153_v33 = vld [vmem:[#allocation3 + $0x1d0] sm:$0xff]  ;;  %v171_v38 = vpack.c.bf16 %v121_v31, %v119_v30  ;;  %v80_v63 = vld [vmem:[#allocation2 + $0x88] sm:$0xff] }
  0x30   :  { %v187_v39 = vpack.c.bf16 %v153_v33, %v151_v32  ;;  %v79_v53 = vld [vmem:[#allocation2 + $0x80] sm:$0xff]  ;;  %v81_v9 = vld [vmem:[#allocation2 + $0x90] sm:$0xff]  ;;  %v82_v21 = vld [vmem:[#allocation2 + $0x98] sm:$0xff] }
  0x31   :  { %v67_v33 = vld [vmem:[#allocation2 + $0x20] sm:$0xff] }
  0x32   :  { %v83_v37 = vld [vmem:[#allocation2 + $0xa0] sm:$0xff] }
  0x36   :  { %360 = vmatmul.mubr.bf16.gmra.mxu0 %v161_v42  ;;  %424 = vmatmul.mubr.bf16.gmra.mxu1 %v177_v43  ;;  %v123_v42 = vld [vmem:[#allocation3 + $0xe0] sm:$0xff]  ;;  %v125_v43 = vld [vmem:[#allocation3 + $0xf0] sm:$0xff] }
  0x37   :  { %367 = vmatprep.mubr.bf16.mxu0 %v164_v44  ;;  %431 = vmatprep.mubr.bf16.mxu1 %v180_v45  ;;  %v155_v44 = vld [vmem:[#allocation3 + $0x1e0] sm:$0xff]  ;;  %v157_v45 = vld [vmem:[#allocation3 + $0x1f0] sm:$0xff]  ;;  %v173_v46 = vpack.c.bf16 %v125_v43, %v123_v42 }
  0x38   :  { %v189_v47 = vpack.c.bf16 %v157_v45, %v155_v44 }
  0x3e   :  { %368 = vmatmul.mubr.bf16.gmra.mxu0 %v163_v54  ;;  %432 = vmatmul.mubr.bf16.gmra.mxu1 %v179_v55 }
  0x3f   :  { %375 = vmatprep.mubr.bf16.mxu0 %v166_v56  ;;  %439 = vmatprep.mubr.bf16.mxu1 %v182_v57 }
  0x46   :  { %376 = vmatmul.mubr.bf16.gmra.mxu0 %v165_v2  ;;  %440 = vmatmul.mubr.bf16.gmra.mxu1 %v181_v3 }
  0x47   :  { %383 = vmatprep.mubr.bf16.mxu0 %v168_v4  ;;  %447 = vmatprep.mubr.bf16.mxu1 %v184_v5 }
  0x4e   :  { %384 = vmatmul.mubr.bf16.gmra.mxu0 %v167_v14  ;;  %448 = vmatmul.mubr.bf16.gmra.mxu1 %v183_v15 }
  0x4f   :  { %391 = vmatprep.mubr.bf16.mxu0 %v170_v16  ;;  %455 = vmatprep.mubr.bf16.mxu1 %v186_v17  ;;  %v66_v17 = vld [vmem:[#allocation2 + $0x18] sm:$0xff] }
  0x56   :  { %392 = vmatmul.mubr.bf16.gmra.mxu0 %v169_v26  ;;  %456 = vmatmul.mubr.bf16.gmra.mxu1 %v185_v27 }
  0x57   :  { %399 = vmatprep.mubr.bf16.mxu0 %v172_v28  ;;  %463 = vmatprep.mubr.bf16.mxu1 %v188_v29 }
  0x5e   :  { %400 = vmatmul.mubr.bf16.gmra.mxu0 %v171_v38  ;;  %464 = vmatmul.mubr.bf16.gmra.mxu1 %v187_v39 }
  0x5f   :  { %407 = vmatprep.mubr.bf16.mxu0 %v174_v40  ;;  %471 = vmatprep.mubr.bf16.mxu1 %v190_v41 }
  0x66   :  { %408 = vmatmul.mubr.bf16.gmra.mxu0 %v173_v46  ;;  %472 = vmatmul.mubr.bf16.gmra.mxu1 %v189_v47 }
  0xee   :  { %v874_v49 = vpop.f32.mrf.mxu0  ;;  %v922_v50 = vpop.f32.mrf.mxu1 }
  0xf0   :  { %v875_v52 = vpop.f32.mrf.mxu0  ;;  %v923_v54 = vpop.f32.mrf.mxu1 }
  0xf1   :  { %v876_v55 = vadd.f32 %v875_v52, %v874_v49  ;;  %v924_v56 = vadd.f32 %v923_v54, %v922_v50  ;;  %v68_v49 = vld [vmem:[#allocation2 + $0x28] sm:$0xff] }
  0xf2   :  { %v877_v57 = vpop.f32.mrf.mxu0  ;;  %v925_v58 = vpop.f32.mrf.mxu1 }
  0xf3   :  { %v480_v59 = vadd.f32 %v876_v55, %v63_v51  ;;  %v496_v60 = vadd.f32 %v924_v56, %v79_v53  ;;  %v84_v53 = vld [vmem:[#allocation2 + $0xa8] sm:$0xff] }
  0xf4   :  { %v878_v62 = vpop.f32.mrf.mxu0  ;;  %v926_v0 = vpop.f32.mrf.mxu1 }
  0xf5   :  { %513 = vst.msk [vmem:[#allocation2] sm:$0xff] %vm30_vm0, %v480_v59  ;;  %529 = vst.msk [vmem:[#allocation2 + $0x80] sm:$0xff] %vm30_vm0, %v496_v60  ;;  %v879_v1 = vadd.f32 %v878_v62, %v877_v57  ;;  %v927_v2 = vadd.f32 %v926_v0, %v925_v58 }
  0xf6   :  { %v880_v3 = vpop.f32.mrf.mxu0  ;;  %v928_v4 = vpop.f32.mrf.mxu1 }
  0xf7   :  { %v481_v5 = vadd.f32 %v879_v1, %v64_v61  ;;  %v497_v6 = vadd.f32 %v927_v2, %v80_v63  ;;  %v69_v1 = vld [vmem:[#allocation2 + $0x30] sm:$0xff] }
  0xf8   :  { %v881_v8 = vpop.f32.mrf.mxu0  ;;  %v929_v10 = vpop.f32.mrf.mxu1 }
  0xf9   :  { %514 = vst.msk [vmem:[#allocation2 + $0x8] sm:$0xff] %vm30_vm0, %v481_v5  ;;  %530 = vst.msk [vmem:[#allocation2 + $0x88] sm:$0xff] %vm30_vm0, %v497_v6  ;;  %v882_v11 = vadd.f32 %v881_v8, %v880_v3  ;;  %v930_v12 = vadd.f32 %v929_v10, %v928_v4  ;;  %v85_v5 = vld [vmem:[#allocation2 + $0xb0] sm:$0xff] }
  0xfa   :  { %v883_v13 = vpop.f32.mrf.mxu0  ;;  %v931_v14 = vpop.f32.mrf.mxu1 }
  0xfb   :  { %v482_v15 = vadd.f32 %v882_v11, %v65_v7  ;;  %v498_v16 = vadd.f32 %v930_v12, %v81_v9 }
  0xfc   :  { %v548_v18 = vld [vmem:[#allocation2] sm:$0xff]  ;;  %v884_v20 = vpop.f32.mrf.mxu0  ;;  %v932_v22 = vpop.f32.mrf.mxu1 }
  0xfd   :  { %v564_v19 = vld [vmem:[#allocation2 + $0x80] sm:$0xff]  ;;  %v580_v23 = vmax.f32 %v548_v18, 0.0  ;;  %515 = vst.msk [vmem:[#allocation2 + $0x10] sm:$0xff] %vm30_vm0, %v482_v15  ;;  %531 = vst.msk [vmem:[#allocation2 + $0x90] sm:$0xff] %vm30_vm0, %v498_v16  ;;  %v885_v25 = vadd.f32 %v884_v20, %v883_v13  ;;  %v933_v26 = vadd.f32 %v932_v22, %v931_v14 }
  0xfe   :  { %v596_v24 = vmax.f32 %v564_v19, 0.0  ;;  %v886_v27 = vpop.f32.mrf.mxu0  ;;  %v934_v28 = vpop.f32.mrf.mxu1 }
  0xff   :  { %v826_v29 = vpack.c.bf16 %v580_v23, %v580_v23  ;;  %v483_v31 = vadd.f32 %v885_v25, %v66_v17  ;;  %v499_v32 = vadd.f32 %v933_v26, %v82_v21  ;;  %v70_v17 = vld [vmem:[#allocation2 + $0x38] sm:$0xff] }
 0x100   :  { %v842_v30 = vpack.c.bf16 %v596_v24, %v596_v24  ;;  %v549_v34 = vld [vmem:[#allocation2 + $0x8] sm:$0xff]  ;;  %v887_v36 = vpop.f32.mrf.mxu0  ;;  %v935_v38 = vpop.f32.mrf.mxu1  ;;  %v86_v21 = vld [vmem:[#allocation2 + $0xb8] sm:$0xff] }
 0x101   :  { %v565_v35 = vld [vmem:[#allocation2 + $0x88] sm:$0xff]  ;;  %741 = vst.msk [vmem:[%s1292_s2] sm:$0xf] %vm740_vm1, %v826_v29  ;;  %v581_v39 = vmax.f32 %v549_v34, 0.0  ;;  %v888_v41 = vadd.f32 %v887_v36, %v886_v27  ;;  %v936_v42 = vadd.f32 %v935_v38, %v934_v28 }
 0x102   :  { %757 = vst.msk [vmem:[%s1292_s2 + $0x40] sm:$0xf] %vm740_vm1, %v842_v30  ;;  %v597_v40 = vmax.f32 %v565_v35, 0.0  ;;  %v889_v43 = vpop.f32.mrf.mxu0  ;;  %v937_v44 = vpop.f32.mrf.mxu1 }
 0x103   :  { %516 = vst.msk [vmem:[#allocation2 + $0x18] sm:$0xff] %vm30_vm0, %v483_v31  ;;  %532 = vst.msk [vmem:[#allocation2 + $0x98] sm:$0xff] %vm30_vm0, %v499_v32  ;;  %v827_v45 = vpack.c.bf16 %v581_v39, %v581_v39  ;;  %v484_v47 = vadd.f32 %v888_v41, %v67_v33  ;;  %v500_v48 = vadd.f32 %v936_v42, %v83_v37  ;;  %v71_v33 = vld [vmem:[#allocation2 + $0x40] sm:$0xff] }
 0x104   :  { %v843_v46 = vpack.c.bf16 %v597_v40, %v597_v40  ;;  %v550_v50 = vld [vmem:[#allocation2 + $0x10] sm:$0xff]  ;;  %v890_v52 = vpop.f32.mrf.mxu0  ;;  %v938_v54 = vpop.f32.mrf.mxu1  ;;  %v87_v37 = vld [vmem:[#allocation2 + $0xc0] sm:$0xff] }
 0x105   :  { %v566_v51 = vld [vmem:[#allocation2 + $0x90] sm:$0xff]  ;;  %742 = vst.msk [vmem:[%s1292_s2 + $0x4] sm:$0xf] %vm740_vm1, %v827_v45  ;;  %v582_v55 = vmax.f32 %v550_v50, 0.0  ;;  %v891_v57 = vadd.f32 %v890_v52, %v889_v43  ;;  %v939_v58 = vadd.f32 %v938_v54, %v937_v44 }
 0x106   :  { %758 = vst.msk [vmem:[%s1292_s2 + $0x44] sm:$0xf] %vm740_vm1, %v843_v46  ;;  %v598_v56 = vmax.f32 %v566_v51, 0.0  ;;  %v892_v59 = vpop.f32.mrf.mxu0  ;;  %v940_v60 = vpop.f32.mrf.mxu1 }
 0x107   :  { %517 = vst.msk [vmem:[#allocation2 + $0x20] sm:$0xff] %vm30_vm0, %v484_v47  ;;  %533 = vst.msk [vmem:[#allocation2 + $0xa0] sm:$0xff] %vm30_vm0, %v500_v48  ;;  %v828_v61 = vpack.c.bf16 %v582_v55, %v582_v55  ;;  %v485_v63 = vadd.f32 %v891_v57, %v68_v49  ;;  %v501_v0 = vadd.f32 %v939_v58, %v84_v53  ;;  %v72_v49 = vld [vmem:[#allocation2 + $0x48] sm:$0xff] }
 0x108   :  { %v844_v62 = vpack.c.bf16 %v598_v56, %v598_v56  ;;  %v893_v4 = vpop.f32.mrf.mxu0  ;;  %v941_v6 = vpop.f32.mrf.mxu1  ;;  %v88_v53 = vld [vmem:[#allocation2 + $0xc8] sm:$0xff] }
 0x109   :  { %743 = vst.msk [vmem:[%s1292_s2 + $0x8] sm:$0xf] %vm740_vm1, %v828_v61  ;;  %v894_v9 = vadd.f32 %v893_v4, %v892_v59  ;;  %v942_v10 = vadd.f32 %v941_v6, %v940_v60 }
 0x10a   :  { %v551_v2 = vld [vmem:[#allocation2 + $0x18] sm:$0xff]  ;;  %759 = vst.msk [vmem:[%s1292_s2 + $0x48] sm:$0xf] %vm740_vm1, %v844_v62  ;;  %v895_v11 = vpop.f32.mrf.mxu0  ;;  %v943_v12 = vpop.f32.mrf.mxu1 }
 0x10b   :  { %v567_v3 = vld [vmem:[#allocation2 + $0x98] sm:$0xff]  ;;  %v583_v7 = vmax.f32 %v551_v2, 0.0  ;;  %518 = vst.msk [vmem:[#allocation2 + $0x28] sm:$0xff] %vm30_vm0, %v485_v63  ;;  %534 = vst.msk [vmem:[#allocation2 + $0xa8] sm:$0xff] %vm30_vm0, %v501_v0  ;;  %v486_v15 = vadd.f32 %v894_v9, %v69_v1  ;;  %v502_v16 = vadd.f32 %v942_v10, %v85_v5  ;;  %v73_v1 = vld [vmem:[#allocation2 + $0x50] sm:$0xff] }
 0x10c   :  { %v599_v8 = vmax.f32 %v567_v3, 0.0  ;;  %v896_v20 = vpop.f32.mrf.mxu0  ;;  %v944_v22 = vpop.f32.mrf.mxu1  ;;  %v89_v5 = vld [vmem:[#allocation2 + $0xd0] sm:$0xff] }
 0x10d   :  { %v829_v13 = vpack.c.bf16 %v583_v7, %v583_v7  ;;  %519 = vst.msk [vmem:[#allocation2 + $0x30] sm:$0xff] %vm30_vm0, %v486_v15  ;;  %535 = vst.msk [vmem:[#allocation2 + $0xb0] sm:$0xff] %vm30_vm0, %v502_v16  ;;  %v897_v25 = vadd.f32 %v896_v20, %v895_v11  ;;  %v945_v26 = vadd.f32 %v944_v22, %v943_v12 }
 0x10e   :  { %v845_v14 = vpack.c.bf16 %v599_v8, %v599_v8  ;;  %v552_v18 = vld [vmem:[#allocation2 + $0x20] sm:$0xff]  ;;  %v898_v27 = vpop.f32.mrf.mxu0  ;;  %v946_v28 = vpop.f32.mrf.mxu1 }
 0x10f   :  { %v568_v19 = vld [vmem:[#allocation2 + $0xa0] sm:$0xff]  ;;  %744 = vst.msk [vmem:[%s1292_s2 + $0xc] sm:$0xf] %vm740_vm1, %v829_v13  ;;  %v584_v23 = vmax.f32 %v552_v18, 0.0  ;;  %v487_v31 = vadd.f32 %v897_v25, %v70_v17  ;;  %v503_v32 = vadd.f32 %v945_v26, %v86_v21  ;;  %v74_v17 = vld [vmem:[#allocation2 + $0x58] sm:$0xff] }
 0x110   :  { %760 = vst.msk [vmem:[%s1292_s2 + $0x4c] sm:$0xf] %vm740_vm1, %v845_v14  ;;  %v600_v24 = vmax.f32 %v568_v19, 0.0  ;;  %v899_v36 = vpop.f32.mrf.mxu0  ;;  %v947_v38 = vpop.f32.mrf.mxu1  ;;  %v90_v21 = vld [vmem:[#allocation2 + $0xd8] sm:$0xff] }
 0x111   :  { %v830_v29 = vpack.c.bf16 %v584_v23, %v584_v23  ;;  %520 = vst.msk [vmem:[#allocation2 + $0x38] sm:$0xff] %vm30_vm0, %v487_v31  ;;  %536 = vst.msk [vmem:[#allocation2 + $0xb8] sm:$0xff] %vm30_vm0, %v503_v32  ;;  %v900_v41 = vadd.f32 %v899_v36, %v898_v27  ;;  %v948_v42 = vadd.f32 %v947_v38, %v946_v28 }
 0x112   :  { %v846_v30 = vpack.c.bf16 %v600_v24, %v600_v24  ;;  %v553_v34 = vld [vmem:[#allocation2 + $0x28] sm:$0xff]  ;;  %v901_v43 = vpop.f32.mrf.mxu0  ;;  %v949_v44 = vpop.f32.mrf.mxu1 }
 0x113   :  { %v569_v35 = vld [vmem:[#allocation2 + $0xa8] sm:$0xff]  ;;  %745 = vst.msk [vmem:[%s1292_s2 + $0x10] sm:$0xf] %vm740_vm1, %v830_v29  ;;  %v585_v39 = vmax.f32 %v553_v34, 0.0  ;;  %v488_v47 = vadd.f32 %v900_v41, %v71_v33  ;;  %v504_v48 = vadd.f32 %v948_v42, %v87_v37  ;;  %v75_v33 = vld [vmem:[#allocation2 + $0x60] sm:$0xff] }
 0x114   :  { %761 = vst.msk [vmem:[%s1292_s2 + $0x50] sm:$0xf] %vm740_vm1, %v846_v30  ;;  %v601_v40 = vmax.f32 %v569_v35, 0.0  ;;  %v554_v50 = vld [vmem:[#allocation2 + $0x30] sm:$0xff]  ;;  %v902_v52 = vpop.f32.mrf.mxu0  ;;  %v950_v54 = vpop.f32.mrf.mxu1  ;;  %v91_v37 = vld [vmem:[#allocation2 + $0xe0] sm:$0xff] }
 0x115   :  { %v831_v45 = vpack.c.bf16 %v585_v39, %v585_v39  ;;  %v570_v51 = vld [vmem:[#allocation2 + $0xb0] sm:$0xff]  ;;  %v586_v55 = vmax.f32 %v554_v50, 0.0  ;;  %521 = vst.msk [vmem:[#allocation2 + $0x40] sm:$0xff] %vm30_vm0, %v488_v47  ;;  %537 = vst.msk [vmem:[#allocation2 + $0xc0] sm:$0xff] %vm30_vm0, %v504_v48  ;;  %v903_v57 = vadd.f32 %v902_v52, %v901_v43  ;;  %v951_v58 = vadd.f32 %v950_v54, %v949_v44 }
 0x116   :  { %v847_v46 = vpack.c.bf16 %v601_v40, %v601_v40  ;;  %v602_v56 = vmax.f32 %v570_v51, 0.0  ;;  %v904_v59 = vpop.f32.mrf.mxu0  ;;  %v952_v60 = vpop.f32.mrf.mxu1 }
 0x117   :  { %746 = vst.msk [vmem:[%s1292_s2 + $0x14] sm:$0xf] %vm740_vm1, %v831_v45  ;;  %v832_v61 = vpack.c.bf16 %v586_v55, %v586_v55  ;;  %v489_v63 = vadd.f32 %v903_v57, %v72_v49  ;;  %v505_v0 = vadd.f32 %v951_v58, %v88_v53  ;;  %v76_v49 = vld [vmem:[#allocation2 + $0x68] sm:$0xff] }
 0x118   :  { %762 = vst.msk [vmem:[%s1292_s2 + $0x54] sm:$0xf] %vm740_vm1, %v847_v46  ;;  %v848_v62 = vpack.c.bf16 %v602_v56, %v602_v56  ;;  %v555_v2 = vld [vmem:[#allocation2 + $0x38] sm:$0xff]  ;;  %v905_v4 = vpop.f32.mrf.mxu0  ;;  %v953_v6 = vpop.f32.mrf.mxu1  ;;  %v92_v53 = vld [vmem:[#allocation2 + $0xe8] sm:$0xff] }
 0x119   :  { %v571_v3 = vld [vmem:[#allocation2 + $0xb8] sm:$0xff]  ;;  %747 = vst.msk [vmem:[%s1292_s2 + $0x18] sm:$0xf] %vm740_vm1, %v832_v61  ;;  %v587_v7 = vmax.f32 %v555_v2, 0.0  ;;  %v906_v9 = vadd.f32 %v905_v4, %v904_v59  ;;  %v954_v10 = vadd.f32 %v953_v6, %v952_v60 }
 0x11a   :  { %763 = vst.msk [vmem:[%s1292_s2 + $0x58] sm:$0xf] %vm740_vm1, %v848_v62  ;;  %v603_v8 = vmax.f32 %v571_v3, 0.0  ;;  %v907_v11 = vpop.f32.mrf.mxu0  ;;  %v955_v12 = vpop.f32.mrf.mxu1 }
 0x11b   :  { %522 = vst.msk [vmem:[#allocation2 + $0x48] sm:$0xff] %vm30_vm0, %v489_v63  ;;  %538 = vst.msk [vmem:[#allocation2 + $0xc8] sm:$0xff] %vm30_vm0, %v505_v0  ;;  %v833_v13 = vpack.c.bf16 %v587_v7, %v587_v7  ;;  %v490_v15 = vadd.f32 %v906_v9, %v73_v1  ;;  %v506_v16 = vadd.f32 %v954_v10, %v89_v5  ;;  %v77_v1 = vld [vmem:[#allocation2 + $0x70] sm:$0xff] }
 0x11c   :  { %v849_v14 = vpack.c.bf16 %v603_v8, %v603_v8  ;;  %v556_v18 = vld [vmem:[#allocation2 + $0x40] sm:$0xff]  ;;  %v908_v20 = vpop.f32.mrf.mxu0  ;;  %v956_v22 = vpop.f32.mrf.mxu1  ;;  %v93_v5 = vld [vmem:[#allocation2 + $0xf0] sm:$0xff] }
 0x11d   :  { %v572_v19 = vld [vmem:[#allocation2 + $0xc0] sm:$0xff]  ;;  %748 = vst.msk [vmem:[%s1292_s2 + $0x1c] sm:$0xf] %vm740_vm1, %v833_v13  ;;  %v588_v23 = vmax.f32 %v556_v18, 0.0  ;;  %v909_v25 = vadd.f32 %v908_v20, %v907_v11  ;;  %v957_v26 = vadd.f32 %v956_v22, %v955_v12 }
 0x11e   :  { %764 = vst.msk [vmem:[%s1292_s2 + $0x5c] sm:$0xf] %vm740_vm1, %v849_v14  ;;  %v604_v24 = vmax.f32 %v572_v19, 0.0  ;;  %v910_v27 = vpop.f32.mrf.mxu0  ;;  %v958_v28 = vpop.f32.mrf.mxu1 }
 0x11f   :  { %523 = vst.msk [vmem:[#allocation2 + $0x50] sm:$0xff] %vm30_vm0, %v490_v15  ;;  %539 = vst.msk [vmem:[#allocation2 + $0xd0] sm:$0xff] %vm30_vm0, %v506_v16  ;;  %v834_v29 = vpack.c.bf16 %v588_v23, %v588_v23  ;;  %v491_v31 = vadd.f32 %v909_v25, %v74_v17  ;;  %v507_v32 = vadd.f32 %v957_v26, %v90_v21  ;;  %v78_v17 = vld [vmem:[#allocation2 + $0x78] sm:$0xff] }
 0x120   :  { %v850_v30 = vpack.c.bf16 %v604_v24, %v604_v24  ;;  %v911_v36 = vpop.f32.mrf.mxu0  ;;  %v959_v38 = vpop.f32.mrf.mxu1  ;;  %v94_v21 = vld [vmem:[#allocation2 + $0xf8] sm:$0xff] }
 0x121   :  { %749 = vst.msk [vmem:[%s1292_s2 + $0x20] sm:$0xf] %vm740_vm1, %v834_v29  ;;  %v912_v41 = vadd.f32 %v911_v36, %v910_v27  ;;  %v960_v42 = vadd.f32 %v959_v38, %v958_v28 }
 0x122   :  { %v557_v34 = vld [vmem:[#allocation2 + $0x48] sm:$0xff]  ;;  %765 = vst.msk [vmem:[%s1292_s2 + $0x60] sm:$0xf] %vm740_vm1, %v850_v30  ;;  %v913_v43 = vpop.f32.mrf.mxu0  ;;  %v961_v44 = vpop.f32.mrf.mxu1 }
 0x123   :  { %v573_v35 = vld [vmem:[#allocation2 + $0xc8] sm:$0xff]  ;;  %v589_v39 = vmax.f32 %v557_v34, 0.0  ;;  %524 = vst.msk [vmem:[#allocation2 + $0x58] sm:$0xff] %vm30_vm0, %v491_v31  ;;  %540 = vst.msk [vmem:[#allocation2 + $0xd8] sm:$0xff] %vm30_vm0, %v507_v32  ;;  %v492_v47 = vadd.f32 %v912_v41, %v75_v33  ;;  %v508_v48 = vadd.f32 %v960_v42, %v91_v37 }
 0x124   :  { %v605_v40 = vmax.f32 %v573_v35, 0.0  ;;  %v914_v52 = vpop.f32.mrf.mxu0  ;;  %v962_v54 = vpop.f32.mrf.mxu1 }
 0x125   :  { %v835_v45 = vpack.c.bf16 %v589_v39, %v589_v39  ;;  %525 = vst.msk [vmem:[#allocation2 + $0x60] sm:$0xff] %vm30_vm0, %v492_v47  ;;  %541 = vst.msk [vmem:[#allocation2 + $0xe0] sm:$0xff] %vm30_vm0, %v508_v48  ;;  %v915_v57 = vadd.f32 %v914_v52, %v913_v43  ;;  %v963_v58 = vadd.f32 %v962_v54, %v961_v44 }
 0x126   :  { %v851_v46 = vpack.c.bf16 %v605_v40, %v605_v40  ;;  %v558_v50 = vld [vmem:[#allocation2 + $0x50] sm:$0xff]  ;;  %v916_v59 = vpop.f32.mrf.mxu0  ;;  %v964_v60 = vpop.f32.mrf.mxu1 }
 0x127   :  { %v574_v51 = vld [vmem:[#allocation2 + $0xd0] sm:$0xff]  ;;  %750 = vst.msk [vmem:[%s1292_s2 + $0x24] sm:$0xf] %vm740_vm1, %v835_v45  ;;  %v590_v55 = vmax.f32 %v558_v50, 0.0  ;;  %v493_v63 = vadd.f32 %v915_v57, %v76_v49  ;;  %v509_v0 = vadd.f32 %v963_v58, %v92_v53 }
 0x128   :  { %766 = vst.msk [vmem:[%s1292_s2 + $0x64] sm:$0xf] %vm740_vm1, %v851_v46  ;;  %v606_v56 = vmax.f32 %v574_v51, 0.0  ;;  %v917_v4 = vpop.f32.mrf.mxu0  ;;  %v965_v6 = vpop.f32.mrf.mxu1 }
 0x129   :  { %v836_v61 = vpack.c.bf16 %v590_v55, %v590_v55  ;;  %526 = vst.msk [vmem:[#allocation2 + $0x68] sm:$0xff] %vm30_vm0, %v493_v63  ;;  %542 = vst.msk [vmem:[#allocation2 + $0xe8] sm:$0xff] %vm30_vm0, %v509_v0  ;;  %v918_v9 = vadd.f32 %v917_v4, %v916_v59  ;;  %v966_v10 = vadd.f32 %v965_v6, %v964_v60 }
 0x12a   :  { %v852_v62 = vpack.c.bf16 %v606_v56, %v606_v56  ;;  %v559_v2 = vld [vmem:[#allocation2 + $0x58] sm:$0xff]  ;;  %v919_v11 = vpop.f32.mrf.mxu0  ;;  %v967_v12 = vpop.f32.mrf.mxu1 }
 0x12b   :  { %v575_v3 = vld [vmem:[#allocation2 + $0xd8] sm:$0xff]  ;;  %751 = vst.msk [vmem:[%s1292_s2 + $0x28] sm:$0xf] %vm740_vm1, %v836_v61  ;;  %v591_v7 = vmax.f32 %v559_v2, 0.0  ;;  %v494_v15 = vadd.f32 %v918_v9, %v77_v1  ;;  %v510_v16 = vadd.f32 %v966_v10, %v93_v5 }
 0x12c   :  { %767 = vst.msk [vmem:[%s1292_s2 + $0x68] sm:$0xf] %vm740_vm1, %v852_v62  ;;  %v607_v8 = vmax.f32 %v575_v3, 0.0  ;;  %v560_v18 = vld [vmem:[#allocation2 + $0x60] sm:$0xff]  ;;  %v920_v20 = vpop.f32.mrf.mxu0  ;;  %v968_v22 = vpop.f32.mrf.mxu1 }
 0x12d   :  { %v837_v13 = vpack.c.bf16 %v591_v7, %v591_v7  ;;  %v576_v19 = vld [vmem:[#allocation2 + $0xe0] sm:$0xff]  ;;  %v592_v23 = vmax.f32 %v560_v18, 0.0  ;;  %527 = vst.msk [vmem:[#allocation2 + $0x70] sm:$0xff] %vm30_vm0, %v494_v15  ;;  %543 = vst.msk [vmem:[#allocation2 + $0xf0] sm:$0xff] %vm30_vm0, %v510_v16  ;;  %v921_v25 = vadd.f32 %v920_v20, %v919_v11  ;;  %v969_v26 = vadd.f32 %v968_v22, %v967_v12 }
 0x12e   :  { %v853_v14 = vpack.c.bf16 %v607_v8, %v607_v8  ;;  %v608_v24 = vmax.f32 %v576_v19, 0.0 }
 0x12f   :  { %752 = vst.msk [vmem:[%s1292_s2 + $0x2c] sm:$0xf] %vm740_vm1, %v837_v13  ;;  %v838_v27 = vpack.c.bf16 %v592_v23, %v592_v23  ;;  %v495_v29 = vadd.f32 %v921_v25, %v78_v17  ;;  %v511_v30 = vadd.f32 %v969_v26, %v94_v21 }
 0x130   :  { %768 = vst.msk [vmem:[%s1292_s2 + $0x6c] sm:$0xf] %vm740_vm1, %v853_v14  ;;  %v854_v28 = vpack.c.bf16 %v608_v24, %v608_v24  ;;  %v561_v31 = vld [vmem:[#allocation2 + $0x68] sm:$0xff] }
 0x131   :  { %v577_v32 = vld [vmem:[#allocation2 + $0xe8] sm:$0xff]  ;;  %753 = vst.msk [vmem:[%s1292_s2 + $0x30] sm:$0xf] %vm740_vm1, %v838_v27  ;;  %v593_v33 = vmax.f32 %v561_v31, 0.0 }
 0x132   :  { %769 = vst.msk [vmem:[%s1292_s2 + $0x70] sm:$0xf] %vm740_vm1, %v854_v28  ;;  %v609_v34 = vmax.f32 %v577_v32, 0.0 }
 0x133   :  { %528 = vst.msk [vmem:[#allocation2 + $0x78] sm:$0xff] %vm30_vm0, %v495_v29  ;;  %544 = vst.msk [vmem:[#allocation2 + $0xf8] sm:$0xff] %vm30_vm0, %v511_v30  ;;  %v839_v35 = vpack.c.bf16 %v593_v33, %v593_v33 }
 0x134   :  { %v855_v36 = vpack.c.bf16 %v609_v34, %v609_v34  ;;  %v562_v37 = vld [vmem:[#allocation2 + $0x70] sm:$0xff] }
 0x135   :  { %v578_v38 = vld [vmem:[#allocation2 + $0xf0] sm:$0xff]  ;;  %754 = vst.msk [vmem:[%s1292_s2 + $0x34] sm:$0xf] %vm740_vm1, %v839_v35  ;;  %v594_v39 = vmax.f32 %v562_v37, 0.0 }
 0x136   :  { %770 = vst.msk [vmem:[%s1292_s2 + $0x74] sm:$0xf] %vm740_vm1, %v855_v36  ;;  %v610_v40 = vmax.f32 %v578_v38, 0.0 }
 0x137   :  { %v840_v41 = vpack.c.bf16 %v594_v39, %v594_v39 }
 0x138   :  { %v856_v42 = vpack.c.bf16 %v610_v40, %v610_v40 }
 0x139   :  { %755 = vst.msk [vmem:[%s1292_s2 + $0x38] sm:$0xf] %vm740_vm1, %v840_v41 }
 0x13a   :  { %v563_v43 = vld [vmem:[#allocation2 + $0x78] sm:$0xff]  ;;  %771 = vst.msk [vmem:[%s1292_s2 + $0x78] sm:$0xf] %vm740_vm1, %v856_v42 }
 0x13b   :  { %v579_v44 = vld [vmem:[#allocation2 + $0xf8] sm:$0xff]  ;;  %v595_v45 = vmax.f32 %v563_v43, 0.0 }
 0x13c   :  { %v611_v46 = vmax.f32 %v579_v44, 0.0 }
 0x13d   :  { %v841_v47 = vpack.c.bf16 %v595_v45, %v595_v45 }
 0x13e   :  { %v857_v48 = vpack.c.bf16 %v611_v46, %v611_v46 }
 0x13f   :  { %756 = vst.msk [vmem:[%s1292_s2 + $0x3c] sm:$0xf] %vm740_vm1, %v841_v47 }
 0x140   :  { %772 = vst.msk [vmem:[%s1292_s2 + $0x7c] sm:$0xf] %vm740_vm1, %v857_v48 }
 0x141   :  { %777 = vsyncpa [#allocation4], 1 }

</bundles_post_ra>
